<compile_context>
chip_gen: v5e
topology: v5e:2x2
jax: 0.10.0
libtpu: 0.0.40
codegen_flags: <defaults>
</compile_context>

<pallas_src>
import jax
import jax.numpy as jnp
from jax.experimental import pallas as pl
from jax.experimental.pallas import tpu as pltpu

# ---- synthetic generator dimensions (small, TPU-friendly) -------------------
BATCH = 8          # small example batch for the __main__ check
LATENT = 32
HIDDEN = 128
IMG_H = 16
IMG_W = 16
OUT = IMG_H * IMG_W  # 256

TM = 128           # batch tile: one full MXU row-tile per grid step
                   # (safe against v7x's 64 MiB VMEM; raise to 256 for huge B)


def _generator_kernel(z_ref, w1_ref, b1_ref, w2_ref, b2_ref, o_ref):
    # layer 1: z @ w1 (bf16 operands, f32 accumulate on the MXU), bias + ReLU in f32
    h = jnp.dot(z_ref[...], w1_ref[...], preferred_element_type=jnp.float32)
    h = jnp.maximum(h + b1_ref[...], 0.0)
    # layer 2: h @ w2 (cast hidden to bf16 so the MXU takes native bf16 passes)
    o = jnp.dot(h.astype(w2_ref.dtype), w2_ref[...],
                preferred_element_type=jnp.float32)
    # epilogue stays f32 (v5e VPU/EUP have no bf16 path)
    o_ref[...] = jnp.tanh(o + b2_ref[...])


def gan_generator_forward(z, w1, b1, w2, b2, *, tm=TM):
    """Pallas implementation of GANModule.forward (== generator(z))."""
    B = z.shape[0]
    # Pad the batch up to a multiple of the 128-row MXU tile.
    b_pad = ((B + tm - 1) // tm) * tm
    if b_pad != B:
        z = jnp.pad(z, ((0, b_pad - B), (0, 0)))

    # bf16 matmul operands (f32 accumulation preserved inside the kernel).
    z_bf = z.astype(jnp.bfloat16)
    w1_bf = w1.astype(jnp.bfloat16)
    w2_bf = w2.astype(jnp.bfloat16)
    # TODO(synk): optional fp8 weight quantization of w2 on v7x once MXU-bound.

    flops = 2 * b_pad * (LATENT * HIDDEN + HIDDEN * OUT)
    bytes_accessed = (z_bf.size * 2 + w1_bf.size * 2 + w2_bf.size * 2
                      + b1.size * 4 + b2.size * 4 + b_pad * OUT * 4)

    out2d = pl.pallas_call(
        _generator_kernel,
        out_shape=jax.ShapeDtypeStruct((b_pad, OUT), jnp.float32),
        grid_spec=pltpu.PrefetchScalarGridSpec(
            num_scalar_prefetch=0,
            grid=(b_pad // tm,),
            in_specs=[
                # z: one (TM, LATENT) batch tile per grid step
                pl.BlockSpec((tm, LATENT), lambda i: (i, 0)),
                # weights / biases: VMEM-resident across all grid steps
                pl.BlockSpec((LATENT, HIDDEN), lambda i: (0, 0)),
                pl.BlockSpec((1, HIDDEN), lambda i: (0, 0)),
                pl.BlockSpec((HIDDEN, OUT), lambda i: (0, 0)),
                pl.BlockSpec((1, OUT), lambda i: (0, 0)),
            ],
            # lane-dense (TM, 256) output tile
            out_specs=pl.BlockSpec((tm, OUT), lambda i: (i, 0)),
        ),
        compiler_params=pltpu.CompilerParams(
            dimension_semantics=("parallel",),   # shards batch across v7x's 2 TCs
        ),
        cost_estimate=pl.CostEstimate(
            flops=flops,
            transcendentals=b_pad * OUT,
            bytes_accessed=bytes_accessed,
        ),
    )(z_bf, w1_bf, b1, w2_bf, b2)

    # Drop batch padding; reshape to NCHW only at the very end (last consumer).
    return out2d[:B].reshape(B, 1, IMG_H, IMG_W)


def init_params(key):
    """Deterministic parameter init (synthetic weights, no checkpoint load)."""
    k1, k2 = jax.random.split(key)
    w1 = jax.random.normal(k1, (LATENT, HIDDEN), jnp.float32) * (1.0 / jnp.sqrt(LATENT))
    b1 = jnp.zeros((1, HIDDEN), jnp.float32)
    w2 = jax.random.normal(k2, (HIDDEN, OUT), jnp.float32) * (1.0 / jnp.sqrt(HIDDEN))
    b2 = jnp.zeros((1, OUT), jnp.float32)
    return w1, b1, w2, b2


def reference_forward(z, w1, b1, w2, b2):
    """Pure-f32 JAX reference (PyTorch semantics)."""
    h = jnp.maximum(z @ w1 + b1, 0.0)
    return jnp.tanh(h @ w2 + b2).reshape(z.shape[0], 1, IMG_H, IMG_W)


if __name__ == "__main__":
    key = jax.random.PRNGKey(0)
    kz, kp = jax.random.split(key)
    z = jax.random.normal(kz, (BATCH, LATENT), jnp.float32)
    w1, b1, w2, b2 = init_params(kp)

    out = gan_generator_forward(z, w1, b1, w2, b2)
    out = jax.block_until_ready(out)

    ref = reference_forward(z, w1, b1, w2, b2)
    assert out.shape == (BATCH, 1, IMG_H, IMG_W)
    # bf16 matmul operands -> loosened tolerance vs. the f32 reference.
    assert jnp.allclose(out, ref, atol=5e-2, rtol=5e-2)

    # NOTE: GANModule.sample() just draws z ~ N(0, I) and calls the same
    # generator; covered by the same kernel (z sampling stays in plain JAX).
    print("KERNEL_OK")
</pallas_src>

<mosaic_0001>
module attributes {stable_mosaic.version = 11 : i64} {
  func.func @_generator_kernel(%arg0: i32, %arg1: memref<128x32xbf16, #tpu.memory_space<vmem>>, %arg2: memref<32x128xbf16, #tpu.memory_space<vmem>>, %arg3: memref<1x128xf32, #tpu.memory_space<vmem>>, %arg4: memref<128x256xbf16, #tpu.memory_space<vmem>>, %arg5: memref<1x256xf32, #tpu.memory_space<vmem>>, %arg6: memref<128x256xf32, #tpu.memory_space<vmem>>) attributes {dimension_semantics = [#tpu.dimension_semantics<parallel>], iteration_bounds = array<i64: 1>, scalar_prefetch = 0 : i64, scratch_operands = 0 : i64, tpu.core_type = #tpu.core_type<tc>, window_params = [{transform_indices = @transform_0, window_bounds = array<i64: 128, 32>}, {pipeline_mode = #tpu.pipeline_mode<synchronous>, transform_indices = @transform_1, window_bounds = array<i64: 32, 128>}, {pipeline_mode = #tpu.pipeline_mode<synchronous>, transform_indices = @transform_2, window_bounds = array<i64: 1, 128>}, {pipeline_mode = #tpu.pipeline_mode<synchronous>, transform_indices = @transform_3, window_bounds = array<i64: 128, 256>}, {pipeline_mode = #tpu.pipeline_mode<synchronous>, transform_indices = @transform_4, window_bounds = array<i64: 1, 256>}, {transform_indices = @transform_5, window_bounds = array<i64: 128, 256>}]} {
    %c0 = arith.constant 0 : index
    %c0_0 = arith.constant 0 : index
    %0 = vector.load %arg1[%c0, %c0_0] : memref<128x32xbf16, #tpu.memory_space<vmem>>, vector<128x32xbf16>
    %c0_1 = arith.constant 0 : index
    %c0_2 = arith.constant 0 : index
    %1 = vector.load %arg2[%c0_1, %c0_2] : memref<32x128xbf16, #tpu.memory_space<vmem>>, vector<32x128xbf16>
    %cst = arith.constant dense<0.000000e+00> : vector<128x128xf32>
    %2 = tpu.matmul %0, %1, %cst {dimension_numbers = #tpu.dot_dimension_numbers<[1], [0], [0], [1], [0, 0, 1, 1], [], []>} : vector<128x32xbf16>, vector<32x128xbf16>, vector<128x128xf32> -> vector<128x128xf32>
    %c0_3 = arith.constant 0 : index
    %c0_4 = arith.constant 0 : index
    %3 = vector.load %arg3[%c0_3, %c0_4] : memref<1x128xf32, #tpu.memory_space<vmem>>, vector<1x128xf32>
    %4 = vector.broadcast %3 : vector<1x128xf32> to vector<128x128xf32>
    %5 = arith.addf %2, %4 : vector<128x128xf32>
    %cst_5 = arith.constant 0.000000e+00 : f32
    %6 = vector.broadcast %cst_5 : f32 to vector<128x128xf32>
    %7 = arith.maximumf %5, %6 : vector<128x128xf32>
    %8 = arith.truncf %7 : vector<128x128xf32> to vector<128x128xbf16>
    %c0_6 = arith.constant 0 : index
    %c0_7 = arith.constant 0 : index
    %9 = vector.load %arg4[%c0_6, %c0_7] : memref<128x256xbf16, #tpu.memory_space<vmem>>, vector<128x256xbf16>
    %cst_8 = arith.constant dense<0.000000e+00> : vector<128x256xf32>
    %10 = tpu.matmul %8, %9, %cst_8 {dimension_numbers = #tpu.dot_dimension_numbers<[1], [0], [0], [1], [0, 0, 1, 1], [], []>} : vector<128x128xbf16>, vector<128x256xbf16>, vector<128x256xf32> -> vector<128x256xf32>
    %c0_9 = arith.constant 0 : index
    %c0_10 = arith.constant 0 : index
    %11 = vector.load %arg5[%c0_9, %c0_10] : memref<1x256xf32, #tpu.memory_space<vmem>>, vector<1x256xf32>
    %12 = vector.broadcast %11 : vector<1x256xf32> to vector<128x256xf32>
    %13 = arith.addf %10, %12 : vector<128x256xf32>
    %14 = math.tanh %13 : vector<128x256xf32>
    %c0_11 = arith.constant 0 : index
    %c0_12 = arith.constant 0 : index
    %15 = vector.load %arg6[%c0_11, %c0_12] : memref<128x256xf32, #tpu.memory_space<vmem>>, vector<128x256xf32>
    tpu.vector_store %arg6[%c0_11, %c0_12], %14 {strides = array<i32>} : memref<128x256xf32, #tpu.memory_space<vmem>>, vector<128x256xf32>,
    return
  }
  func.func @transform_0(%arg0: i32) -> (i32, i32) {
    %c0_i32 = arith.constant 0 : i32
    %c0_i32_0 = arith.constant 0 : i32
    return %arg0, %c0_i32 : i32, i32
  }
  func.func @transform_1(%arg0: i32) -> (i32, i32) {
    %c0_i32 = arith.constant 0 : i32
    %c0_i32_0 = arith.constant 0 : i32
    %c0_i32_1 = arith.constant 0 : i32
    return %c0_i32, %c0_i32_0 : i32, i32
  }
  func.func @transform_2(%arg0: i32) -> (i32, i32) {
    %c0_i32 = arith.constant 0 : i32
    %c0_i32_0 = arith.constant 0 : i32
    %c0_i32_1 = arith.constant 0 : i32
    return %c0_i32, %c0_i32_0 : i32, i32
  }
  func.func @transform_3(%arg0: i32) -> (i32, i32) {
    %c0_i32 = arith.constant 0 : i32
    %c0_i32_0 = arith.constant 0 : i32
    %c0_i32_1 = arith.constant 0 : i32
    return %c0_i32, %c0_i32_0 : i32, i32
  }
  func.func @transform_4(%arg0: i32) -> (i32, i32) {
    %c0_i32 = arith.constant 0 : i32
    %c0_i32_0 = arith.constant 0 : i32
    %c0_i32_1 = arith.constant 0 : i32
    return %c0_i32, %c0_i32_0 : i32, i32
  }
  func.func @transform_5(%arg0: i32) -> (i32, i32) {
    %c0_i32 = arith.constant 0 : i32
    %c0_i32_0 = arith.constant 0 : i32
    return %arg0, %c0_i32 : i32, i32
  }
}

</mosaic_0001>

<bundles_post_ra>
// kernel: tpu_custom_call.1
= control target key start
LH: loop header
LB: loop body
LE: loop exit
PB: predicated region body
PF: predicated region fallthrough
CT: control target
= control target key end

     0   :  { %10 = vsyncpa [#allocation3], 0  ;;  %s916_s0 = inlined_call_operand.vmem [shape: bf16[128,32], index: 0, kind: input, shape index: {}]   ;;  %s917_s1 = inlined_call_operand.vmem [shape: bf16[32,128], index: 1, kind: input, shape index: {}]   ;;  %s918_s2 = inlined_call_operand.vmem [shape: f32[1,128], index: 2, kind: input, shape index: {}]   ;;  %s919_s3 = inlined_call_operand.hbm [shape: bf16[128,256], index: 3, kind: input, shape index: {}]   ;;  %s920_s4 = inlined_call_operand.vmem [shape: f32[1,256], index: 4, kind: input, shape index: {}]   ;;  %s921_s5 = inlined_call_operand.hbm [shape: f32[128,256], index: 5, kind: output, shape index: {}]  }
   0x1   :  { %11 = vsyncpa [#allocation4], 0  ;;  %s22_s20 = sshll.u32 %s919_s3, 4  ;;  %s772_s21 = smov [#allocation2]   ;;  %s23_s20 = int_to_ptr.hbm [resolvable:$true] %s22_s20 }
   0x2   :  { %s24_s22 = sshll.u32 %s772_s21, 4  ;;  %s773_s23 = smov 128   ;;  %s25_s22 = int_to_ptr.vmem [resolvable:$true] %s24_s22 }
   0x3   :  { %s774_s24 = smov 8  }
   0x4   :  { %30 = dma.hbm_to_vmem [thread:$0]  %s23_s20, 2048, %s25_s22, [#allocation3], %s773_s23, %s773_s23, %s774_s24  }
   0x5   :  { %768 = dma.done.wait [#allocation3], 2048  }
   0x6   :  { %769 = vsyncadd [#allocation3], 4294965248  ;;  %v616_v0 = vld [vmem:[%s917_s1 + $0x8] sm:$0xff]  ;;  %v615_v1 = vld [vmem:[%s917_s1] sm:$0xff]  ;;  %vm114_vm0 = vcmask 261120   ;;  %s482_s23 = sshll.u32 %s921_s5, 4  ;;  %s483_s23 = int_to_ptr.hbm [resolvable:$true] %s482_s23 }
   0x7   :  { %145 = vmatpush.bf16.msra.mxu0 %v616_v0  ;;  %v607_v2 = vld [vmem:[%s916_s0] sm:$0xff]  ;;  %v608_v3 = vld [vmem:[%s916_s0 + $0x8] sm:$0xff]  ;;  %v609_v4 = vld [vmem:[%s916_s0 + $0x10] sm:$0xff]  ;;  %s776_s24 = smov 256   ;;  %s777_s25 = smov 16  }
   0x8   :  { %v610_v5 = vld [vmem:[%s916_s0 + $0x18] sm:$0xff]  ;;  %v611_v6 = vld [vmem:[%s916_s0 + $0x20] sm:$0xff]  ;;  %v601_v7 = vld [vmem:[#allocation2 + $0x70] sm:$0xf] }
   0x9   :  { %v632_v8 = vld [vmem:[#allocation2 + $0x74] sm:$0xf0]  ;;  %v631_v9 = vld [vmem:[#allocation2 + $0x74] sm:$0xf]  ;;  %v603_v11 = vld [vmem:[#allocation2 + $0x78] sm:$0xf0] }
   0xa   :  { %v602_v10 = vor.u32 %v632_v8, %v601_v7  ;;  %v837_v12 = vor.u32 %v631_v9, %v603_v11  ;;  %v612_v13 = vld [vmem:[%s916_s0 + $0x28] sm:$0xff]  ;;  %v593_v14 = vld [vmem:[#allocation2 + $0x60] sm:$0xf]  ;;  %v629_v16 = vld [vmem:[#allocation2 + $0x64] sm:$0xf] }
   0xb   :  { %146 = vmatpush.bf16.msra.mxu0 %v615_v1  ;;  %v630_v15 = vld [vmem:[#allocation2 + $0x64] sm:$0xf0]  ;;  %v595_v18 = vld [vmem:[#allocation2 + $0x68] sm:$0xf0]  ;;  %v585_v20 = vld [vmem:[#allocation2 + $0x50] sm:$0xf] }
   0xc   :  { %314 = vmatpush.bf16.msra.mxu1 %v602_v10  ;;  %633 = vmatpush.bf16.msra.mxu3 %v602_v10  ;;  %v594_v17 = vor.u32 %v630_v15, %v593_v14  ;;  %v598_v19 = vor.u32 %v629_v16, %v595_v18  ;;  %v628_v21 = vld [vmem:[#allocation2 + $0x54] sm:$0xf0]  ;;  %v627_v22 = vld [vmem:[#allocation2 + $0x54] sm:$0xf]  ;;  %v587_v24 = vld [vmem:[#allocation2 + $0x58] sm:$0xf0] }
   0xd   :  { %363 = vmatpush.bf16.msra.mxu2 %v837_v12  ;;  %v586_v23 = vor.u32 %v628_v21, %v585_v20  ;;  %v590_v25 = vor.u32 %v627_v22, %v587_v24  ;;  %v577_v26 = vld [vmem:[#allocation2 + $0x40] sm:$0xf]  ;;  %v626_v27 = vld [vmem:[#allocation2 + $0x44] sm:$0xf0]  ;;  %v625_v28 = vld [vmem:[#allocation2 + $0x44] sm:$0xf] }
   0xe   :  { %535 = vmatmul.msk.bf16.vlgmr.msra.gmra.mxu0 %vm114_vm0, %v607_v2  ;;  %v579_v29 = vld [vmem:[#allocation2 + $0x48] sm:$0xf0]  ;;  %v578_v30 = vor.u32 %v626_v27, %v577_v26  ;;  %v569_v32 = vld [vmem:[#allocation2 + $0x30] sm:$0xf]  ;;  %v624_v33 = vld [vmem:[#allocation2 + $0x34] sm:$0xf0] }
   0xf   :  { %v582_v31 = vor.u32 %v625_v28, %v579_v29  ;;  %v623_v34 = vld [vmem:[#allocation2 + $0x34] sm:$0xf]  ;;  %v570_v35 = vor.u32 %v624_v33, %v569_v32  ;;  %v571_v36 = vld [vmem:[#allocation2 + $0x38] sm:$0xf0]  ;;  %v561_v39 = vld [vmem:[#allocation2 + $0x20] sm:$0xf] }
  0x10   :  { %315 = vmatpush.bf16.msra.mxu1 %v594_v17  ;;  %634 = vmatpush.bf16.msra.mxu3 %v594_v17  ;;  %v613_v37 = vld [vmem:[%s916_s0 + $0x30] sm:$0xff]  ;;  %v574_v38 = vor.u32 %v623_v34, %v571_v36  ;;  %v622_v40 = vld [vmem:[#allocation2 + $0x24] sm:$0xf0]  ;;  %v621_v41 = vld [vmem:[#allocation2 + $0x24] sm:$0xf] }
  0x11   :  { %364 = vmatpush.bf16.msra.mxu2 %v598_v19  ;;  %v562_v42 = vor.u32 %v622_v40, %v561_v39  ;;  %v563_v43 = vld [vmem:[#allocation2 + $0x28] sm:$0xf0]  ;;  %v553_v45 = vld [vmem:[#allocation2 + $0x10] sm:$0xf]  ;;  %v620_v46 = vld [vmem:[#allocation2 + $0x14] sm:$0xf0] }
  0x12   :  { %v566_v44 = vor.u32 %v621_v41, %v563_v43  ;;  %v619_v47 = vld [vmem:[#allocation2 + $0x14] sm:$0xf]  ;;  %v554_v48 = vor.u32 %v620_v46, %v553_v45  ;;  %v555_v49 = vld [vmem:[#allocation2 + $0x18] sm:$0xf0]  ;;  %v545_v51 = vld [vmem:[#allocation2] sm:$0xf] }
  0x13   :  { %v558_v50 = vor.u32 %v619_v47, %v555_v49  ;;  %v618_v52 = vld [vmem:[#allocation2 + $0x4] sm:$0xf0]  ;;  %v617_v53 = vld [vmem:[#allocation2 + $0x4] sm:$0xf]  ;;  %v547_v55 = vld [vmem:[#allocation2 + $0x8] sm:$0xf0] }
  0x14   :  { %316 = vmatpush.bf16.msra.mxu1 %v586_v23  ;;  %635 = vmatpush.bf16.msra.mxu3 %v586_v23  ;;  %v546_v54 = vor.u32 %v618_v52, %v545_v51  ;;  %v550_v56 = vor.u32 %v617_v53, %v547_v55  ;;  %v614_v57 = vld [vmem:[%s916_s0 + $0x38] sm:$0xff]  ;;  %v856_v59 = vld [vmem:[%s918_s2] ss:$0 sm:$0xff] }
  0x15   :  { %365 = vmatpush.bf16.msra.mxu2 %v590_v25  ;;  %v228_v51 = vld [vmem:[%s920_s4] sm:$0x3]  ;;  %s775_s4 = smov [#allocation5]  }
  0x16   :  { %v877_v52 = vperm.slane %v228_v51, 0  ;;  %v880_v55 = vperm.slane %v228_v51, 1  ;;  %s480_s20 = sshll.u32 %s775_s4, 4  ;;  %s481_s20 = int_to_ptr.vmem [resolvable:$true] %s480_s20 }
  0x18   :  { %317 = vmatpush.bf16.msra.mxu1 %v578_v30  ;;  %636 = vmatpush.bf16.msra.mxu3 %v578_v30 }
  0x19   :  { %366 = vmatpush.bf16.msra.mxu2 %v582_v31 }
  0x1c   :  { %318 = vmatpush.bf16.msra.mxu1 %v570_v35  ;;  %637 = vmatpush.bf16.msra.mxu3 %v570_v35 }
  0x1d   :  { %367 = vmatpush.bf16.msra.mxu2 %v574_v38 }
  0x1e   :  { %536 = vmatmul.msk.bf16.gmra.mxu0 %vm114_vm0, %v608_v3 }
  0x20   :  { %319 = vmatpush.bf16.msra.mxu1 %v562_v42  ;;  %638 = vmatpush.bf16.msra.mxu3 %v562_v42 }
  0x21   :  { %368 = vmatpush.bf16.msra.mxu2 %v566_v44 }
  0x24   :  { %320 = vmatpush.bf16.msra.mxu1 %v554_v48  ;;  %639 = vmatpush.bf16.msra.mxu3 %v554_v48 }
  0x25   :  { %369 = vmatpush.bf16.msra.mxu2 %v558_v50 }
  0x28   :  { %321 = vmatpush.bf16.msra.mxu1 %v546_v54  ;;  %640 = vmatpush.bf16.msra.mxu3 %v546_v54 }
  0x29   :  { %370 = vmatpush.bf16.msra.mxu2 %v550_v56 }
  0x2c   :  { %641 = vmatpush.bf16.msrb.mxu3 %v837_v12 }
  0x2e   :  { %537 = vmatmul.msk.bf16.gmra.mxu0 %vm114_vm0, %v609_v4 }
  0x30   :  { %642 = vmatpush.bf16.msrb.mxu3 %v598_v19 }
  0x34   :  { %643 = vmatpush.bf16.msrb.mxu3 %v590_v25 }
  0x38   :  { %644 = vmatpush.bf16.msrb.mxu3 %v582_v31 }
  0x3c   :  { %645 = vmatpush.bf16.msrb.mxu3 %v574_v38 }
  0x3e   :  { %538 = vmatmul.msk.bf16.gmra.mxu0 %vm114_vm0, %v610_v5 }
  0x40   :  { %646 = vmatpush.bf16.msrb.mxu3 %v566_v44 }
  0x44   :  { %647 = vmatpush.bf16.msrb.mxu3 %v558_v50 }
  0x48   :  { %648 = vmatpush.bf16.msrb.mxu3 %v550_v56 }
  0x4e   :  { %539 = vmatmul.msk.bf16.gmra.mxu0 %vm114_vm0, %v611_v6 }
  0x5e   :  { %540 = vmatmul.msk.bf16.gmra.mxu0 %vm114_vm0, %v612_v13 }
  0x6e   :  { %541 = vmatmul.msk.bf16.gmra.mxu0 %vm114_vm0, %v613_v37 }
  0x7e   :  { %542 = vmatmul.msk.bf16.gmra.mxu0 %vm114_vm0, %v614_v57 }
  0x8b   :  { %v148_v58 = vpop.f32.mrf.mxu0 }
  0x8c   :  { %v149_v60 = vadd.f32 %v856_v59, %v148_v58 }
  0x8e   :  { %v188_v63 = vmax.f32 %v149_v60, 0.0 }
  0x93   :  { %v150_v61 = vpop.f32.mrf.mxu0 }
  0x94   :  { %v151_v62 = vadd.f32 %v856_v59, %v150_v61 }
  0x96   :  { %v189_v0 = vmax.f32 %v151_v62, 0.0 }
  0x98   :  { %v204_v1 = vpack.c.bf16 %v189_v0, %v188_v63 }
  0x9a   :  { %322 = vmatmul.bf16.vlgmr.msra.gmra.mxu1 %v204_v1  ;;  %371 = vmatmul.bf16.vlgmr.msra.gmra.mxu2 %v204_v1 }
  0x9b   :  { %v153_v2 = vpop.f32.mrf.mxu0 }
  0x9c   :  { %v154_v3 = vadd.f32 %v856_v59, %v153_v2 }
  0x9e   :  { %v190_v6 = vmax.f32 %v154_v3, 0.0 }
  0xa3   :  { %v155_v4 = vpop.f32.mrf.mxu0 }
  0xa4   :  { %v156_v5 = vadd.f32 %v856_v59, %v155_v4 }
  0xa6   :  { %v191_v7 = vmax.f32 %v156_v5, 0.0 }
  0xa8   :  { %v205_v8 = vpack.c.bf16 %v191_v7, %v190_v6 }
  0xaa   :  { %327 = vmatmul.bf16.gmra.mxu1 %v205_v8  ;;  %376 = vmatmul.bf16.gmra.mxu2 %v205_v8 }
  0xab   :  { %v158_v9 = vpop.f32.mrf.mxu0 }
  0xac   :  { %v159_v10 = vadd.f32 %v856_v59, %v158_v9 }
  0xae   :  { %v192_v13 = vmax.f32 %v159_v10, 0.0 }
  0xb3   :  { %v160_v11 = vpop.f32.mrf.mxu0 }
  0xb4   :  { %v161_v12 = vadd.f32 %v856_v59, %v160_v11 }
  0xb6   :  { %v193_v14 = vmax.f32 %v161_v12, 0.0 }
  0xb8   :  { %v206_v15 = vpack.c.bf16 %v193_v14, %v192_v13 }
  0xba   :  { %332 = vmatmul.bf16.gmra.mxu1 %v206_v15  ;;  %381 = vmatmul.bf16.gmra.mxu2 %v206_v15 }
  0xbb   :  { %v163_v16 = vpop.f32.mrf.mxu0 }
  0xbc   :  { %v164_v17 = vadd.f32 %v856_v59, %v163_v16 }
  0xbe   :  { %v194_v20 = vmax.f32 %v164_v17, 0.0 }
  0xc3   :  { %v165_v18 = vpop.f32.mrf.mxu0 }
  0xc4   :  { %v166_v19 = vadd.f32 %v856_v59, %v165_v18 }
  0xc6   :  { %v195_v21 = vmax.f32 %v166_v19, 0.0 }
  0xc8   :  { %v207_v22 = vpack.c.bf16 %v195_v21, %v194_v20 }
  0xca   :  { %337 = vmatmul.bf16.gmra.mxu1 %v207_v22  ;;  %386 = vmatmul.bf16.gmra.mxu2 %v207_v22 }
  0xcb   :  { %v168_v23 = vpop.f32.mrf.mxu0 }
  0xcc   :  { %v169_v24 = vadd.f32 %v856_v59, %v168_v23 }
  0xce   :  { %v196_v27 = vmax.f32 %v169_v24, 0.0 }
  0xd3   :  { %v170_v25 = vpop.f32.mrf.mxu0 }
  0xd4   :  { %v171_v26 = vadd.f32 %v856_v59, %v170_v25 }
  0xd6   :  { %v197_v28 = vmax.f32 %v171_v26, 0.0 }
  0xd8   :  { %v208_v29 = vpack.c.bf16 %v197_v28, %v196_v27 }
  0xda   :  { %342 = vmatmul.bf16.gmra.mxu1 %v208_v29  ;;  %391 = vmatmul.bf16.gmra.mxu2 %v208_v29 }
  0xdb   :  { %v173_v30 = vpop.f32.mrf.mxu0 }
  0xdc   :  { %v174_v31 = vadd.f32 %v856_v59, %v173_v30 }
  0xde   :  { %v198_v34 = vmax.f32 %v174_v31, 0.0 }
  0xe3   :  { %v175_v32 = vpop.f32.mrf.mxu0 }
  0xe4   :  { %v176_v33 = vadd.f32 %v856_v59, %v175_v32 }
  0xe6   :  { %v199_v35 = vmax.f32 %v176_v33, 0.0 }
  0xe8   :  { %v209_v36 = vpack.c.bf16 %v199_v35, %v198_v34 }
  0xea   :  { %347 = vmatmul.bf16.gmra.mxu1 %v209_v36  ;;  %396 = vmatmul.bf16.gmra.mxu2 %v209_v36 }
  0xeb   :  { %v178_v37 = vpop.f32.mrf.mxu0 }
  0xec   :  { %v179_v38 = vadd.f32 %v856_v59, %v178_v37 }
  0xee   :  { %v200_v41 = vmax.f32 %v179_v38, 0.0 }
  0xf3   :  { %v180_v39 = vpop.f32.mrf.mxu0 }
  0xf4   :  { %v181_v40 = vadd.f32 %v856_v59, %v180_v39 }
  0xf6   :  { %v201_v42 = vmax.f32 %v181_v40, 0.0 }
  0xf8   :  { %v210_v43 = vpack.c.bf16 %v201_v42, %v200_v41 }
  0xfa   :  { %352 = vmatmul.bf16.vlgmr.msra.gmra.mxu3 %v210_v43 }
  0xfb   :  { %v183_v44 = vpop.f32.mrf.mxu0 }
  0xfc   :  { %v184_v45 = vadd.f32 %v856_v59, %v183_v44 }
  0xfe   :  { %v202_v48 = vmax.f32 %v184_v45, 0.0 }
 0x103   :  { %v185_v46 = vpop.f32.mrf.mxu0 }
 0x104   :  { %v186_v47 = vadd.f32 %v856_v59, %v185_v46 }
 0x106   :  { %v203_v49 = vmax.f32 %v186_v47, 0.0 }
 0x108   :  { %v211_v50 = vpack.c.bf16 %v203_v49, %v202_v48 }
 0x10a   :  { %357 = vmatmul.bf16.gmra.mxu3 %v211_v50 }
 0x117   :  { %v323_v53 = vpop.f32.mrf.mxu1 }
 0x118   :  { %v324_v54 = vadd.f32 %v323_v53, %v877_v52 }
 0x11a   :  { %656 = vtanh.f32 %v324_v54  ;;  %401 = vmatmul.bf16.vlgmr.msrb.gmra.mxu3 %v210_v43 }
 0x11d   :  { %v372_v56 = vpop.f32.mrf.mxu2 }
 0x11e   :  { %v373_v57 = vadd.f32 %v372_v56, %v880_v55 }
 0x11f   :  { %v325_v58 = vpop.f32.mrf.mxu1 }
 0x120   :  { %v657_v59 = vpop.eup %656  ;;  %658 = vtanh.f32 %v373_v57  ;;  %v326_v60 = vadd.f32 %v325_v58, %v877_v52 }
 0x121   :  { %444 = vst [vmem:[#allocation5] sm:$0xff] %v657_v59 }
 0x122   :  { %660 = vtanh.f32 %v326_v60 }
 0x125   :  { %v374_v61 = vpop.f32.mrf.mxu2 }
 0x126   :  { %v659_v62 = vpop.eup %658  ;;  %v375_v63 = vadd.f32 %v374_v61, %v880_v55 }
 0x127   :  { %445 = vst [vmem:[#allocation5 + $0x8] sm:$0xff] %v659_v62  ;;  %v328_v0 = vpop.f32.mrf.mxu1 }
 0x128   :  { %v661_v1 = vpop.eup %660  ;;  %662 = vtanh.f32 %v375_v63  ;;  %v329_v2 = vadd.f32 %v328_v0, %v877_v52 }
 0x129   :  { %446 = vst [vmem:[#allocation5 + $0x10] sm:$0xff] %v661_v1 }
 0x12a   :  { %664 = vtanh.f32 %v329_v2  ;;  %406 = vmatmul.bf16.gmra.mxu3 %v211_v50 }
 0x12d   :  { %v377_v3 = vpop.f32.mrf.mxu2 }
 0x12e   :  { %v663_v4 = vpop.eup %662  ;;  %v378_v5 = vadd.f32 %v377_v3, %v880_v55 }
 0x12f   :  { %447 = vst [vmem:[#allocation5 + $0x18] sm:$0xff] %v663_v4  ;;  %v330_v6 = vpop.f32.mrf.mxu1 }
 0x130   :  { %v665_v7 = vpop.eup %664  ;;  %666 = vtanh.f32 %v378_v5  ;;  %v331_v8 = vadd.f32 %v330_v6, %v877_v52 }
 0x131   :  { %448 = vst [vmem:[#allocation5 + $0x20] sm:$0xff] %v665_v7 }
 0x132   :  { %668 = vtanh.f32 %v331_v8 }
 0x135   :  { %v379_v9 = vpop.f32.mrf.mxu2 }
 0x136   :  { %v667_v10 = vpop.eup %666  ;;  %v380_v11 = vadd.f32 %v379_v9, %v880_v55 }
 0x137   :  { %449 = vst [vmem:[#allocation5 + $0x28] sm:$0xff] %v667_v10  ;;  %v333_v12 = vpop.f32.mrf.mxu1 }
 0x138   :  { %v669_v13 = vpop.eup %668  ;;  %670 = vtanh.f32 %v380_v11  ;;  %v334_v14 = vadd.f32 %v333_v12, %v877_v52 }
 0x139   :  { %450 = vst [vmem:[#allocation5 + $0x30] sm:$0xff] %v669_v13 }
 0x13a   :  { %672 = vtanh.f32 %v334_v14 }
 0x13d   :  { %v382_v15 = vpop.f32.mrf.mxu2 }
 0x13e   :  { %v671_v16 = vpop.eup %670  ;;  %v383_v17 = vadd.f32 %v382_v15, %v880_v55 }
 0x13f   :  { %451 = vst [vmem:[#allocation5 + $0x38] sm:$0xff] %v671_v16  ;;  %v335_v18 = vpop.f32.mrf.mxu1 }
 0x140   :  { %v673_v19 = vpop.eup %672  ;;  %674 = vtanh.f32 %v383_v17  ;;  %v336_v20 = vadd.f32 %v335_v18, %v877_v52 }
 0x141   :  { %452 = vst [vmem:[#allocation5 + $0x40] sm:$0xff] %v673_v19 }
 0x142   :  { %676 = vtanh.f32 %v336_v20 }
 0x145   :  { %v384_v21 = vpop.f32.mrf.mxu2 }
 0x146   :  { %v675_v22 = vpop.eup %674  ;;  %v385_v23 = vadd.f32 %v384_v21, %v880_v55 }
 0x147   :  { %453 = vst [vmem:[#allocation5 + $0x48] sm:$0xff] %v675_v22  ;;  %v338_v24 = vpop.f32.mrf.mxu1 }
 0x148   :  { %v677_v25 = vpop.eup %676  ;;  %678 = vtanh.f32 %v385_v23  ;;  %v339_v26 = vadd.f32 %v338_v24, %v877_v52 }
 0x149   :  { %454 = vst [vmem:[#allocation5 + $0x50] sm:$0xff] %v677_v25 }
 0x14a   :  { %680 = vtanh.f32 %v339_v26 }
 0x14d   :  { %v387_v27 = vpop.f32.mrf.mxu2 }
 0x14e   :  { %v679_v28 = vpop.eup %678  ;;  %v388_v29 = vadd.f32 %v387_v27, %v880_v55 }
 0x14f   :  { %455 = vst [vmem:[#allocation5 + $0x58] sm:$0xff] %v679_v28  ;;  %v340_v30 = vpop.f32.mrf.mxu1 }
 0x150   :  { %v681_v31 = vpop.eup %680  ;;  %682 = vtanh.f32 %v388_v29  ;;  %v341_v32 = vadd.f32 %v340_v30, %v877_v52 }
 0x151   :  { %456 = vst [vmem:[#allocation5 + $0x60] sm:$0xff] %v681_v31 }
 0x152   :  { %684 = vtanh.f32 %v341_v32 }
 0x155   :  { %v389_v33 = vpop.f32.mrf.mxu2 }
 0x156   :  { %v683_v34 = vpop.eup %682  ;;  %v390_v35 = vadd.f32 %v389_v33, %v880_v55 }
 0x157   :  { %457 = vst [vmem:[#allocation5 + $0x68] sm:$0xff] %v683_v34  ;;  %v343_v36 = vpop.f32.mrf.mxu1 }
 0x158   :  { %v685_v37 = vpop.eup %684  ;;  %686 = vtanh.f32 %v390_v35  ;;  %v344_v38 = vadd.f32 %v343_v36, %v877_v52 }
 0x159   :  { %458 = vst [vmem:[#allocation5 + $0x70] sm:$0xff] %v685_v37 }
 0x15a   :  { %688 = vtanh.f32 %v344_v38 }
 0x15d   :  { %v392_v39 = vpop.f32.mrf.mxu2 }
 0x15e   :  { %v687_v40 = vpop.eup %686  ;;  %v393_v41 = vadd.f32 %v392_v39, %v880_v55 }
 0x15f   :  { %459 = vst [vmem:[#allocation5 + $0x78] sm:$0xff] %v687_v40  ;;  %v345_v42 = vpop.f32.mrf.mxu1 }
 0x160   :  { %v689_v43 = vpop.eup %688  ;;  %690 = vtanh.f32 %v393_v41  ;;  %v346_v44 = vadd.f32 %v345_v42, %v877_v52 }
 0x161   :  { %460 = vst [vmem:[#allocation5 + $0x80] sm:$0xff] %v689_v43 }
 0x162   :  { %692 = vtanh.f32 %v346_v44 }
 0x165   :  { %v394_v45 = vpop.f32.mrf.mxu2 }
 0x166   :  { %v691_v46 = vpop.eup %690  ;;  %v395_v47 = vadd.f32 %v394_v45, %v880_v55 }
 0x167   :  { %461 = vst [vmem:[#allocation5 + $0x88] sm:$0xff] %v691_v46  ;;  %v348_v48 = vpop.f32.mrf.mxu1 }
 0x168   :  { %v693_v49 = vpop.eup %692  ;;  %694 = vtanh.f32 %v395_v47  ;;  %v349_v50 = vadd.f32 %v348_v48, %v877_v52 }
 0x169   :  { %462 = vst [vmem:[#allocation5 + $0x90] sm:$0xff] %v693_v49 }
 0x16a   :  { %696 = vtanh.f32 %v349_v50 }
 0x16d   :  { %v397_v51 = vpop.f32.mrf.mxu2 }
 0x16e   :  { %v695_v53 = vpop.eup %694  ;;  %v398_v54 = vadd.f32 %v397_v51, %v880_v55 }
 0x16f   :  { %463 = vst [vmem:[#allocation5 + $0x98] sm:$0xff] %v695_v53  ;;  %v350_v56 = vpop.f32.mrf.mxu1 }
 0x170   :  { %v697_v57 = vpop.eup %696  ;;  %698 = vtanh.f32 %v398_v54  ;;  %v351_v58 = vadd.f32 %v350_v56, %v877_v52 }
 0x171   :  { %464 = vst [vmem:[#allocation5 + $0xa0] sm:$0xff] %v697_v57 }
 0x172   :  { %700 = vtanh.f32 %v351_v58 }
 0x175   :  { %v399_v59 = vpop.f32.mrf.mxu2 }
 0x176   :  { %v699_v60 = vpop.eup %698  ;;  %v400_v61 = vadd.f32 %v399_v59, %v880_v55 }
 0x177   :  { %465 = vst [vmem:[#allocation5 + $0xa8] sm:$0xff] %v699_v60 }
 0x178   :  { %v701_v62 = vpop.eup %700  ;;  %702 = vtanh.f32 %v400_v61 }
 0x179   :  { %466 = vst [vmem:[#allocation5 + $0xb0] sm:$0xff] %v701_v62 }
 0x17d   :  { %v353_v63 = vpop.f32.mrf.mxu3 }
 0x17e   :  { %v703_v0 = vpop.eup %702  ;;  %v354_v1 = vadd.f32 %v353_v63, %v877_v52 }
 0x17f   :  { %467 = vst [vmem:[#allocation5 + $0xb8] sm:$0xff] %v703_v0 }
 0x180   :  { %704 = vtanh.f32 %v354_v1 }
 0x185   :  { %v355_v2 = vpop.f32.mrf.mxu3 }
 0x186   :  { %v705_v3 = vpop.eup %704  ;;  %v356_v4 = vadd.f32 %v355_v2, %v877_v52 }
 0x187   :  { %468 = vst [vmem:[#allocation5 + $0xc0] sm:$0xff] %v705_v3 }
 0x188   :  { %706 = vtanh.f32 %v356_v4 }
 0x18d   :  { %v358_v5 = vpop.f32.mrf.mxu3 }
 0x18e   :  { %v707_v6 = vpop.eup %706  ;;  %v359_v7 = vadd.f32 %v358_v5, %v877_v52 }
 0x18f   :  { %470 = vst [vmem:[#allocation5 + $0xd0] sm:$0xff] %v707_v6 }
 0x190   :  { %708 = vtanh.f32 %v359_v7 }
 0x195   :  { %v360_v8 = vpop.f32.mrf.mxu3 }
 0x196   :  { %v709_v9 = vpop.eup %708  ;;  %v361_v10 = vadd.f32 %v360_v8, %v877_v52 }
 0x197   :  { %472 = vst [vmem:[#allocation5 + $0xe0] sm:$0xff] %v709_v9 }
 0x198   :  { %710 = vtanh.f32 %v361_v10 }
 0x19d   :  { %v402_v11 = vpop.f32.mrf.mxu3 }
 0x19e   :  { %v711_v12 = vpop.eup %710  ;;  %v403_v13 = vadd.f32 %v402_v11, %v880_v55 }
 0x19f   :  { %474 = vst [vmem:[#allocation5 + $0xf0] sm:$0xff] %v711_v12 }
 0x1a0   :  { %712 = vtanh.f32 %v403_v13 }
 0x1a5   :  { %v404_v14 = vpop.f32.mrf.mxu3 }
 0x1a6   :  { %v713_v15 = vpop.eup %712  ;;  %v405_v16 = vadd.f32 %v404_v14, %v880_v55 }
 0x1a7   :  { %469 = vst [vmem:[#allocation5 + $0xc8] sm:$0xff] %v713_v15 }
 0x1a8   :  { %714 = vtanh.f32 %v405_v16 }
 0x1ad   :  { %v407_v17 = vpop.f32.mrf.mxu3 }
 0x1ae   :  { %v715_v18 = vpop.eup %714  ;;  %v408_v19 = vadd.f32 %v407_v17, %v880_v55 }
 0x1af   :  { %471 = vst [vmem:[#allocation5 + $0xd8] sm:$0xff] %v715_v18 }
 0x1b0   :  { %716 = vtanh.f32 %v408_v19 }
 0x1b5   :  { %v409_v52 = vpop.f32.mrf.mxu3 }
 0x1b6   :  { %v717_v20 = vpop.eup %716  ;;  %v410_v21 = vadd.f32 %v409_v52, %v880_v55 }
 0x1b7   :  { %473 = vst [vmem:[#allocation5 + $0xe8] sm:$0xff] %v717_v20 }
 0x1b8   :  { %718 = vtanh.f32 %v410_v21 }
 0x1be   :  { %v719_v22 = vpop.eup %718 }
 0x1bf   :  { %475 = vst [vmem:[#allocation5 + $0xf8] sm:$0xff] %v719_v22 }
 0x1c0   :  { %488 = dma.vmem_to_hbm [thread:$0]  %s481_s20, 4096, %s483_s23, [#allocation4], %s776_s24, %s776_s24, %s777_s25  }
 0x1c1   :  { %770 = dma.done.wait [#allocation4], 4096  }
 0x1c2   :  { %771 = vsyncadd [#allocation4], 4294963200 }
 0x1c3   :  { %493 = vsyncpa [#allocation3], 1 }
 0x1c4   :  { %494 = vsyncpa [#allocation4], 1 }

</bundles_post_ra>
